<compile_context>
chip_gen: v5e
topology: v5e:2x2
jax: 0.10.0
libtpu: 0.0.40
codegen_flags: <defaults>
</compile_context>

<pallas_src>
import jax
import jax.numpy as jnp
from jax.experimental import pallas as pl
from jax.experimental.pallas import tpu as pltpu


def netvlad_kernel(x_ref, w_ref, b_ref, c_ref, out_ref, acc_ref, s_ref):
    # x_ref:   (1, D, TN)  one N-tile of one batch element (native layout)
    # w_ref:   (K, D)      1x1-conv weight = 2*alpha*C
    # b_ref:   (K, 1)      1x1-conv bias   = -alpha*||C_k||
    # c_ref:   (K, D)      cluster centers
    # out_ref: (1, K, D)   per-batch VLAD (written on the last N-tile only)
    # acc_ref: (K, D) f32  scratch accumulator: sum_n a[k,n] * x[d,n]
    # s_ref:   (K, 1) f32  scratch accumulator: sum_n a[k,n]
    nt = pl.program_id(1)

    @pl.when(nt == 0)
    def _init():
        acc_ref[...] = jnp.zeros_like(acc_ref)
        s_ref[...] = jnp.zeros_like(s_ref)

    x = x_ref[0]                                            # (D, TN)

    # 1x1 conv == matmul over the feature dim; output (K, TN) keeps the N tile
    # on the lane axis (wide MXU output).
    logits = jnp.dot(w_ref[...], x, preferred_element_type=jnp.float32)
    logits = logits + b_ref[...]                            # (K,1) bcast over lanes

    # softmax over clusters (sublane axis); reciprocal runs on the EUP.
    m = jnp.max(logits, axis=0, keepdims=True)              # (1, TN)
    e = jnp.exp(logits - m)
    a = e * pl.reciprocal(jnp.sum(e, axis=0, keepdims=True), approx=False)

    # acc[k,d] += sum_n a[k,n] * x[d,n]  (contract N of both operands; no a.T)
    acc_ref[...] += jax.lax.dot_general(
        a, x, dimension_numbers=(((1,), (1,)), ((), ())),
        preferred_element_type=jnp.float32)
    s_ref[...] += jnp.sum(a, axis=1, keepdims=True)         # (K, 1)

    @pl.when(nt == pl.num_programs(1) - 1)
    def _finalize():
        # vlad[k,d] = sum_n a[k,n]*x[d,n] - C[k,d] * sum_n a[k,n]
        vlad = acc_ref[...] - s_ref[...] * c_ref[...]       # (K, D)

        # intra-normalization over D  (F.normalize: x / max(||x||, 1e-12))
        row_sq = jnp.sum(vlad * vlad, axis=-1, keepdims=True)
        vlad = vlad * jax.lax.rsqrt(jnp.maximum(row_sq, 1e-24))

        # global L2 normalization over the flattened K*D vector
        g_sq = jnp.sum(vlad * vlad, axis=(0, 1), keepdims=True)
        vlad = vlad * jax.lax.rsqrt(jnp.maximum(g_sq, 1e-24))

        out_ref[0] = vlad.astype(out_ref.dtype)


def _pick_n_tile(n, target=512):
    """Largest multiple of 128 dividing N, capped at `target`; else full N."""
    if n % 128 != 0:
        return n  # full-extent block is always legal
    tn = 128
    while tn * 2 <= min(n, target) and n % (tn * 2) == 0:
        tn *= 2
    return tn


def netvlad_forward(x_nchw, cluster_centers, alpha, *, tn_target=512):
    """x_nchw: (B, D, H, W) f32 ; cluster_centers: (K, D) ; returns (B, K*D)."""
    B, D, H, W = x_nchw.shape
    K = cluster_centers.shape[0]
    N = H * W

    # Native layout: NCHW -> (B, D, N) is a free, contiguous reshape (no HBM pass).
    x_bdn = x_nchw.reshape(B, D, N)

    # Parameter setup (mirrors Conv2d init_params).
    c = cluster_centers.astype(jnp.float32)
    w = (2.0 * alpha * c)                                        # (K, D)
    b = (-alpha * jnp.linalg.norm(c, axis=1)).reshape(K, 1)      # (K, 1)

    tn = _pick_n_tile(N, tn_target)
    n_tiles = N // tn

    out = pl.pallas_call(
        netvlad_kernel,
        out_shape=jax.ShapeDtypeStruct((B, K, D), jnp.float32),
        grid_spec=pltpu.PrefetchScalarGridSpec(
            num_scalar_prefetch=0,
            grid=(B, n_tiles),                      # reduction axis (N) last
            in_specs=[
                pl.BlockSpec((1, D, tn), lambda bb, nn: (bb, 0, nn)),
                pl.BlockSpec((K, D), lambda bb, nn: (0, 0)),
                pl.BlockSpec((K, 1), lambda bb, nn: (0, 0)),
                pl.BlockSpec((K, D), lambda bb, nn: (0, 0)),
            ],
            out_specs=pl.BlockSpec((1, K, D), lambda bb, nn: (bb, 0, 0)),
            scratch_shapes=[
                pltpu.VMEM((K, D), jnp.float32),
                pltpu.VMEM((K, 1), jnp.float32),
            ],
        ),
        compiler_params=pltpu.CompilerParams(
            dimension_semantics=("parallel", "arbitrary")),
    )(x_bdn, w, b, c)

    # Contiguous reshape -> free in XLA.
    return out.reshape(B, K * D)


def netvlad_reference(x_nchw, cluster_centers, alpha):
    """Pure-JAX reference mirroring the PyTorch forward exactly."""
    B, D, H, W = x_nchw.shape
    K = cluster_centers.shape[0]
    N = H * W
    x_flat = x_nchw.reshape(B, D, N)                              # (B, D, N)
    w = 2.0 * alpha * cluster_centers                             # (K, D)
    b = -alpha * jnp.linalg.norm(cluster_centers, axis=1)         # (K,)
    logits = jnp.einsum("kd,bdn->bkn", w, x_flat) + b[None, :, None]
    a = jax.nn.softmax(logits, axis=1)                            # (B, K, N)
    resid = x_flat[:, None, :, :] - cluster_centers[None, :, :, None]  # (B,K,D,N)
    vlad = jnp.sum(resid * a[:, :, None, :], axis=-1)             # (B, K, D)
    vlad = vlad / jnp.maximum(
        jnp.linalg.norm(vlad, axis=2, keepdims=True), 1e-12)
    vlad = vlad.reshape(B, -1)
    vlad = vlad / jnp.maximum(
        jnp.linalg.norm(vlad, axis=1, keepdims=True), 1e-12)
    return vlad


if __name__ == "__main__":
    # Small but lane-filling shapes: N = 1024 -> two 512-wide N-tiles per batch,
    # exercising the scratch accumulators and the pl.when finalize path.
    B, D, H, W = 2, 64, 32, 32
    K = 16
    alpha = 1.0

    key = jax.random.PRNGKey(0)
    kx, kc = jax.random.split(key)
    x = jax.random.normal(kx, (B, D, H, W), dtype=jnp.float32)
    # torch.rand -> uniform [0, 1)
    cluster_centers = jax.random.uniform(kc, (K, D), dtype=jnp.float32)

    out = netvlad_forward(x, cluster_centers, alpha)
    out = jax.block_until_ready(out)

    ref = netvlad_reference(x, cluster_centers, alpha)
    assert out.shape == (B, K * D)
    assert jnp.allclose(out, ref, atol=2e-5, rtol=2e-5), "mismatch vs reference"

    print("KERNEL_OK")
</pallas_src>

<mosaic_0001>
module attributes {stable_mosaic.version = 11 : i64} {
  func.func @netvlad_kernel(%arg0: i32, %arg1: i32, %arg2: memref<1x64x512xf32, #tpu.memory_space<vmem>>, %arg3: memref<16x64xf32, #tpu.memory_space<vmem>>, %arg4: memref<16x1xf32, #tpu.memory_space<vmem>>, %arg5: memref<16x64xf32, #tpu.memory_space<vmem>>, %arg6: memref<1x16x64xf32, #tpu.memory_space<vmem>>, %arg7: memref<16x64xf32, #tpu.memory_space<vmem>>, %arg8: memref<16x1xf32, #tpu.memory_space<vmem>>) attributes {dimension_semantics = [#tpu.dimension_semantics<parallel>, #tpu.dimension_semantics<arbitrary>], iteration_bounds = array<i64: 2, 2>, scalar_prefetch = 0 : i64, scratch_operands = 2 : i64, tpu.core_type = #tpu.core_type<tc>, window_params = [{transform_indices = @transform_0, window_bounds = array<i64: 1, 64, 512>}, {pipeline_mode = #tpu.pipeline_mode<synchronous>, transform_indices = @transform_1, window_bounds = array<i64: 16, 64>}, {pipeline_mode = #tpu.pipeline_mode<synchronous>, transform_indices = @transform_2, window_bounds = array<i64: 16, 1>}, {pipeline_mode = #tpu.pipeline_mode<synchronous>, transform_indices = @transform_3, window_bounds = array<i64: 16, 64>}, {transform_indices = @transform_4, window_bounds = array<i64: 1, 16, 64>}]} {
    %c0_i32 = arith.constant 0 : i32
    %0 = arith.cmpi eq, %arg1, %c0_i32 : i32
    %1 = arith.extui %0 : i1 to i32
    %c0_i32_0 = arith.constant 0 : i32
    %2 = arith.cmpi ne, %1, %c0_i32_0 : i32
    scf.if %2 {
      %cst_20 = arith.constant 0.000000e+00 : f32
      %32 = vector.broadcast %cst_20 : f32 to vector<16x64xf32>
      %c0_21 = arith.constant 0 : index
      %c0_22 = arith.constant 0 : index
      %33 = vector.load %arg7[%c0_21, %c0_22] : memref<16x64xf32, #tpu.memory_space<vmem>>, vector<16x64xf32>
      tpu.vector_store %arg7[%c0_21, %c0_22], %32 {strides = array<i32>} : memref<16x64xf32, #tpu.memory_space<vmem>>, vector<16x64xf32>,
      %cst_23 = arith.constant 0.000000e+00 : f32
      %34 = vector.broadcast %cst_23 : f32 to vector<16x1xf32>
      %c0_24 = arith.constant 0 : index
      %c0_25 = arith.constant 0 : index
      %35 = vector.load %arg8[%c0_24, %c0_25] : memref<16x1xf32, #tpu.memory_space<vmem>>, vector<16x1xf32>
      tpu.vector_store %arg8[%c0_24, %c0_25], %34 {strides = array<i32>} : memref<16x1xf32, #tpu.memory_space<vmem>>, vector<16x1xf32>,
    } else {
    }
    %c0 = arith.constant 0 : index
    %c0_1 = arith.constant 0 : index
    %c0_2 = arith.constant 0 : index
    %3 = vector.load %arg2[%c0, %c0_1, %c0_2] : memref<1x64x512xf32, #tpu.memory_space<vmem>>, vector<1x64x512xf32>
    %4 = vector.shape_cast %3 : vector<1x64x512xf32> to vector<64x512xf32>
    %c0_3 = arith.constant 0 : index
    %c0_4 = arith.constant 0 : index
    %5 = vector.load %arg3[%c0_3, %c0_4] : memref<16x64xf32, #tpu.memory_space<vmem>>, vector<16x64xf32>
    %cst = arith.constant dense<0.000000e+00> : vector<16x512xf32>
    %6 = tpu.matmul %5, %4, %cst {dimension_numbers = #tpu.dot_dimension_numbers<[1], [0], [0], [1], [0, 0, 1, 1], [], []>} : vector<16x64xf32>, vector<64x512xf32>, vector<16x512xf32> -> vector<16x512xf32>
    %c0_5 = arith.constant 0 : index
    %c0_6 = arith.constant 0 : index
    %7 = vector.load %arg4[%c0_5, %c0_6] : memref<16x1xf32, #tpu.memory_space<vmem>>, vector<16x1xf32>
    %8 = vector.broadcast %7 : vector<16x1xf32> to vector<16x512xf32>
    %9 = arith.addf %6, %8 : vector<16x512xf32>
    %cst_7 = arith.constant dense<0xFF800000> : vector<512xf32>
    %10 = vector.multi_reduction <maximumf>, %9, %cst_7 [0] : vector<16x512xf32> to vector<512xf32>
    %11 = vector.shape_cast %10 : vector<512xf32> to vector<1x512xf32>
    %12 = vector.broadcast %11 : vector<1x512xf32> to vector<16x512xf32>
    %13 = arith.subf %9, %12 : vector<16x512xf32>
    %14 = math.exp %13 : vector<16x512xf32>
    %cst_8 = arith.constant dense<0.000000e+00> : vector<512xf32>
    %15 = vector.multi_reduction <add>, %14, %cst_8 [0] : vector<16x512xf32> to vector<512xf32>
    %16 = vector.shape_cast %15 : vector<512xf32> to vector<1x512xf32>
    %17 = tpu.reciprocal %16 : vector<1x512xf32> -> vector<1x512xf32>
    %18 = vector.broadcast %17 : vector<1x512xf32> to vector<16x512xf32>
    %19 = arith.mulf %14, %18 : vector<16x512xf32>
    %c0_9 = arith.constant 0 : index
    %c0_10 = arith.constant 0 : index
    %20 = vector.load %arg7[%c0_9, %c0_10] : memref<16x64xf32, #tpu.memory_space<vmem>>, vector<16x64xf32>
    %cst_11 = arith.constant dense<0.000000e+00> : vector<16x64xf32>
    %21 = tpu.matmul %19, %4, %cst_11 {dimension_numbers = #tpu.dot_dimension_numbers<[1], [1], [0], [0], [0, 0, 1, 0], [], []>} : vector<16x512xf32>, vector<64x512xf32>, vector<16x64xf32> -> vector<16x64xf32>
    %22 = arith.addf %20, %21 : vector<16x64xf32>
    %c0_12 = arith.constant 0 : index
    %c0_13 = arith.constant 0 : index
    %23 = vector.load %arg7[%c0_12, %c0_13] : memref<16x64xf32, #tpu.memory_space<vmem>>, vector<16x64xf32>
    tpu.vector_store %arg7[%c0_12, %c0_13], %22 {strides = array<i32>} : memref<16x64xf32, #tpu.memory_space<vmem>>, vector<16x64xf32>,
    %c0_14 = arith.constant 0 : index
    %c0_15 = arith.constant 0 : index
    %24 = vector.load %arg8[%c0_14, %c0_15] : memref<16x1xf32, #tpu.memory_space<vmem>>, vector<16x1xf32>
    %cst_16 = arith.constant dense<0.000000e+00> : vector<16xf32>
    %25 = vector.multi_reduction <add>, %19, %cst_16 [1] : vector<16x512xf32> to vector<16xf32>
    %26 = vector.shape_cast %25 : vector<16xf32> to vector<16x1xf32>
    %27 = arith.addf %24, %26 : vector<16x1xf32>
    %c0_17 = arith.constant 0 : index
    %c0_18 = arith.constant 0 : index
    %28 = vector.load %arg8[%c0_17, %c0_18] : memref<16x1xf32, #tpu.memory_space<vmem>>, vector<16x1xf32>
    tpu.vector_store %arg8[%c0_17, %c0_18], %27 {strides = array<i32>} : memref<16x1xf32, #tpu.memory_space<vmem>>, vector<16x1xf32>,
    %c1_i32 = arith.constant 1 : i32
    %29 = arith.cmpi eq, %arg1, %c1_i32 : i32
    %30 = arith.extui %29 : i1 to i32
    %c0_i32_19 = arith.constant 0 : i32
    %31 = arith.cmpi ne, %30, %c0_i32_19 : i32
    scf.if %31 {
      %c0_20 = arith.constant 0 : index
      %c0_21 = arith.constant 0 : index
      %32 = vector.load %arg7[%c0_20, %c0_21] : memref<16x64xf32, #tpu.memory_space<vmem>>, vector<16x64xf32>
      %c0_22 = arith.constant 0 : index
      %c0_23 = arith.constant 0 : index
      %33 = vector.load %arg8[%c0_22, %c0_23] : memref<16x1xf32, #tpu.memory_space<vmem>>, vector<16x1xf32>
      %c0_24 = arith.constant 0 : index
      %c0_25 = arith.constant 0 : index
      %34 = vector.load %arg5[%c0_24, %c0_25] : memref<16x64xf32, #tpu.memory_space<vmem>>, vector<16x64xf32>
      %35 = vector.broadcast %33 : vector<16x1xf32> to vector<16x64xf32>
      %36 = arith.mulf %35, %34 : vector<16x64xf32>
      %37 = arith.subf %32, %36 : vector<16x64xf32>
      %38 = arith.mulf %37, %37 : vector<16x64xf32>
      %cst_26 = arith.constant dense<0.000000e+00> : vector<16xf32>
      %39 = vector.multi_reduction <add>, %38, %cst_26 [1] : vector<16x64xf32> to vector<16xf32>
      %40 = vector.shape_cast %39 : vector<16xf32> to vector<16x1xf32>
      %cst_27 = arith.constant 1.000000e-24 : f32
      %41 = vector.broadcast %cst_27 : f32 to vector<16x1xf32>
      %42 = arith.maximumf %40, %41 : vector<16x1xf32>
      %43 = math.rsqrt %42 : vector<16x1xf32>
      %44 = vector.broadcast %43 : vector<16x1xf32> to vector<16x64xf32>
      %45 = arith.mulf %37, %44 : vector<16x64xf32>
      %46 = arith.mulf %45, %45 : vector<16x64xf32>
      %47 = vector.shape_cast %46 : vector<16x64xf32> to vector<1x16x64xf32>
      %cst_28 = arith.constant dense<0.000000e+00> : vector<1xf32>
      %48 = vector.multi_reduction <add>, %47, %cst_28 [1, 2] : vector<1x16x64xf32> to vector<1xf32>
      %49 = vector.shape_cast %48 : vector<1xf32> to vector<1x1x1xf32>
      %50 = vector.extract %49[0, 0, 0] : f32 from vector<1x1x1xf32>
      %51 = vector.broadcast %50 : f32 to vector<1x1xf32>
      %cst_29 = arith.constant 1.000000e-24 : f32
      %52 = vector.broadcast %cst_29 : f32 to vector<1x1xf32>
      %53 = arith.maximumf %51, %52 : vector<1x1xf32>
      %54 = math.rsqrt %53 : vector<1x1xf32>
      %55 = vector.broadcast %54 : vector<1x1xf32> to vector<16x64xf32>
      %56 = arith.mulf %45, %55 : vector<16x64xf32>
      %c0_30 = arith.constant 0 : index
      %c0_31 = arith.constant 0 : index
      %c0_32 = arith.constant 0 : index
      %57 = vector.load %arg6[%c0_30, %c0_31, %c0_32] : memref<1x16x64xf32, #tpu.memory_space<vmem>>, vector<1x16x64xf32>
      %58 = vector.shape_cast %57 : vector<1x16x64xf32> to vector<16x64xf32>
      %59 = vector.shape_cast %56 : vector<16x64xf32> to vector<1x16x64xf32>
      tpu.vector_store %arg6[%c0_30, %c0_31, %c0_32], %59 {strides = array<i32>} : memref<1x16x64xf32, #tpu.memory_space<vmem>>, vector<1x16x64xf32>,
    } else {
    }
    return
  }
  func.func @transform_0(%arg0: i32, %arg1: i32) -> (i32, i32, i32) {
    %c0_i32 = arith.constant 0 : i32
    %c0_i32_0 = arith.constant 0 : i32
    return %arg0, %c0_i32, %arg1 : i32, i32, i32
  }
  func.func @transform_1(%arg0: i32, %arg1: i32) -> (i32, i32) {
    %c0_i32 = arith.constant 0 : i32
    %c0_i32_0 = arith.constant 0 : i32
    %c0_i32_1 = arith.constant 0 : i32
    return %c0_i32, %c0_i32_0 : i32, i32
  }
  func.func @transform_2(%arg0: i32, %arg1: i32) -> (i32, i32) {
    %c0_i32 = arith.constant 0 : i32
    %c0_i32_0 = arith.constant 0 : i32
    %c0_i32_1 = arith.constant 0 : i32
    return %c0_i32, %c0_i32_0 : i32, i32
  }
  func.func @transform_3(%arg0: i32, %arg1: i32) -> (i32, i32) {
    %c0_i32 = arith.constant 0 : i32
    %c0_i32_0 = arith.constant 0 : i32
    %c0_i32_1 = arith.constant 0 : i32
    return %c0_i32, %c0_i32_0 : i32, i32
  }
  func.func @transform_4(%arg0: i32, %arg1: i32) -> (i32, i32, i32) {
    %c0_i32 = arith.constant 0 : i32
    %c0_i32_0 = arith.constant 0 : i32
    %c0_i32_1 = arith.constant 0 : i32
    return %arg0, %c0_i32, %c0_i32_0 : i32, i32, i32
  }
}

</mosaic_0001>

<bundles_post_ra>
// kernel: tpu_custom_call.1
= control target key start
LH: loop header
LB: loop body
LE: loop exit
PB: predicated region body
PF: predicated region fallthrough
CT: control target
= control target key end

     0   :  { %s1665_s0 = inlined_call_operand.hbm [shape: f32[2,64,1024], index: 0, kind: input, shape index: {}]   ;;  %s1666_s1 = inlined_call_operand.vmem [shape: f32[16,64], index: 1, kind: input, shape index: {}]   ;;  %s1667_s2 = inlined_call_operand.vmem [shape: f32[16,1], index: 2, kind: input, shape index: {}]   ;;  %s1668_s3 = inlined_call_operand.hbm [shape: f32[16,64], index: 3, kind: input, shape index: {}]   ;;  %s1669_s4 = inlined_call_operand.hbm [shape: f32[2,16,64], index: 4, kind: output, shape index: {}]  }
   0x1   :  { %1679 = sst [smem:[#allocation20_spill]] %s1667_s2 }
   0x2   :  { %1680 = sst [smem:[#allocation21_spill]] %s1668_s3 }
   0x3   :  { %1681 = sst [smem:[#allocation22_spill]] %s1669_s4 }
   0x4   :  { %9 = vsyncpa [#allocation5], 0 }
   0x5   :  { %11 = vsyncpa [#allocation5 + $0x1], 0 }
   0x6   :  { %12 = vsyncpa [#allocation8], 0 }
   0x7   :  { %13 = vsyncpa [#allocation6], 0 }
   0x8   :  { %15 = vsyncpa [#allocation6 + $0x1], 0  ;;  %s1275_s15 = smov 0   ;;  %s1277_s16 = smov 0  }
   0x9   :  { %s1279_s17 = smov 0   ;;  %s1281_s18 = smov 0  }
   0xa   :  { %s1283_s19 = smov 0   ;;  %s1285_s20 = smov 0  }
   0xb   :  { %s1287_s21 = smov 0   ;;  %s1289_s22 = smov 0  }
   0xc   :  { %s1291_s23 = smov 0   ;;  %s1293_s24 = smov 0  }
   0xd   :  { %s1295_s25 = smov 0  }
   0xe LB: > { %1682 = sst [smem:[#allocation13_spill]] %s1197_s15  ;;  %s865_s26 = sadd.s32 4294967295, %s1237_s25   ;;  %s1237_s25 = sphi %s1295_s25, %s21_s25   ;;  %s1233_s24 = sphi %s1293_s24, %s1713_s24   ;;  %s1229_s23 = sphi %s1291_s23, %s1704_s23   ;;  %s1225_s22 = sphi %s1289_s22, %s1712_s22   ;;  %s1221_s21 = sphi %s1287_s21, %s1703_s21   ;;  %s1217_s20 = sphi %s1285_s20, %s1711_s20   ;;  %s1213_s19 = sphi %s1283_s19, %s1710_s19   ;;  %s1209_s18 = sphi %s1281_s18, %s1709_s18   ;;  %s1205_s17 = sphi %s1279_s17, %s1708_s17   ;;  %s1201_s16 = sphi %s1277_s16, %s1707_s16   ;;  %s1197_s15 = sphi %s1275_s15, %s1706_s15  }
   0xf   : > { %1683 = sst [smem:[#allocation14_spill]] %s1225_s22  ;;  %s866_s27 = sadd.s32 4294967294, %s1237_s25  }
  0x10   : > { %1684 = sst [smem:[#allocation15_spill]] %s1229_s23  ;;  %p55_p0 = scmp.ne.s32.totalorder %s1213_s19, %s1209_s18 }
  0x11   : > { %p1331_p1 = scmp.eq.s32.totalorder %s865_s26, 0  ;;  %s131_s29 = sadd.s32 1, %s1205_s17 }
  0x12   : > { %p141_p2 = scmp.ne.s32.totalorder %s1205_s17, %s1201_s16  ;;  %p142_p4 = scmp.eq.s32.totalorder %s865_s26, 3 }
  0x13   : > { %p1340_p3 = por %p1331_p1, %p55_p0  ;;  %p147_p5 = scmp.ne.s32.totalorder %s1201_s16, %s1197_s15 }
  0x14   : > { %p148_p6 = scmp.eq.s32.totalorder %s866_s27, 3  ;;  %p1346_p7 = por %p142_p4, %p141_p2 }
  0x15   : > { %p867_p8 = scmp.ge.s32.totalorder %s1237_s25, 1  ;;  %p155_p10 = scmp.lt.s32.totalorder %s1237_s25, 5 }
  0x16   : > { %s1687_s5 = scalar_select %p1346_p7, 1, 0 }
  0x17   : > { %p1351_p9 = por %p148_p6, %p147_p5  ;;  %s1691_s3 = sld [smem:[#allocation21_spill]] }
  0x18   : > { %1688 = sst [smem:[#allocation16_spill]] %s1687_s5  ;;  %p1359_p11 = pnand %p867_p8, %p155_p10 }
  0x19   : > { %s1689_s6 = scalar_select %p1351_p9, 1, 0 }
  0x1a   : > { %p904_p12 = pneg %p1359_p11  ;;  %s1239_s11 = smov [#allocation7]  }
  0x1b   : > { %1690 = sst [smem:[#allocation17_spill]] %s1689_s6  ;;  %s174_s12 = sshll.u32 %s1239_s11, 4  ;;  %s175_s12 = int_to_ptr.vmem [resolvable:$true] %s174_s12 }
  0x1c   : > { %p905_p13 = pnand %p904_p12, %p1331_p1  ;;  %s1240_s13 = smov 128  }
  0x1d   : > { %s172_s9 = sshll.u32 %s1691_s3, 4  ;;  %s1241_s14 = smov 8   ;;  %s173_s9 = int_to_ptr.hbm [resolvable:$true] %s172_s9 }
  0x1e   : > { %907 = dma.hbm_to_vmem [thread:$0]  (!%p905_p13), %s173_s9, 256, %s175_s12, [#allocation8], %s1240_s13, %s1240_s13, %s1241_s14  }
  0x1f   : > { %s30_s18 = sadd.s32 1, %s1229_s23  ;;  %s33_s26 = sadd.s32 1, %s1233_s24 }
  0x20   : > { %p31_p0 = scmp.ge.s32.totalorder %s30_s18, 2  ;;  %s42_s27 = sadd.s32 1, %s1217_s20 }
  0x21   : > { %p49_p2 = scmp.ne.s32.totalorder %s1217_s20, %s1213_s19  ;;  %p50_p4 = scmp.eq.s32.totalorder %s1237_s25, 0 }
  0x22   : > { %s1715_s18 = smov (%p31_p0, %s30_s18), 0  ;;  %s1717_s26 = smov (!%p31_p0, %s33_s26), %s1233_s24 }
  0x23   : > { %1693 = sst [smem:[#allocation18_spill]] %s1715_s18  ;;  %s38_s7 = ssub.s32 %s1229_s23, %s1715_s18 }
  0x24   : > { %p35_p5 = scmp.ge.s32.totalorder %s1717_s26, 2  ;;  %p917_p6 = scmp.lt.s32.totalorder %s1237_s25, 4 }
  0x25   : > { %p1379_p8 = por %p50_p4, %p49_p2  ;;  %s188_s9 = sand.u32 1, %s1217_s20  }
  0x26   : > { %s1719_s26 = smov (%p35_p5, %s1717_s26), 0  ;;  %s870_s11 = sshll.u32 %s188_s9, 8 }
  0x27   : > { %1695 = sst [smem:[#allocation19_spill]] %s1719_s26  ;;  %s37_s12 = ssub.s32 %s1233_s24, %s1719_s26 }
  0x28   : > { %s39_s13 = sor.u32 %s38_s7, %s37_s12  ;;  %p129_p10 = scmp.eq.s32.totalorder %s37_s12, 0 }
  0x29   : > { %p40_p12 = scmp.eq.s32.totalorder %s39_s13, 0  ;;  %s871_s14 = sshll.u32 %s1229_s23, 2 }
  0x2a   : > { %s1392_s3 = scalar_select %p129_p10, %s1205_s17, %s131_s29  }
  0x2b   : > { %s1395_s18 = scalar_select %p40_p12, %s1217_s20, %s42_s27  }
  0x2c   : > { %s872_s6 = sshll.u32 %s1233_s24, 6  ;;  %s192_s15 = scalar_lea.vmem [#allocation4], %s870_s11 }
  0x2d   : > { %s202_s4 = sshll.u32 %s192_s15, 4  ;;  %s197_s5 = sadd.s32 %s872_s6, %s871_s14  ;;  %s203_s4 = int_to_ptr.vmem [resolvable:$true] %s202_s4 }
  0x2e   : > { %s873_s22 = sshll.u32 %s197_s5, 3  ;;  %p909_p13 = pnand %p917_p6, %p1379_p8 }
  0x2f   : > { %s199_s7 = scalar_lea.hbm %s1665_s0, %s873_s22  ;;  %s189_s13 = scalar_lea.sflag [#allocation5], %s188_s9 }
  0x30   : > { %s200_s12 = sshll.u32 %s199_s7, 4  ;;  %s1242_s29 = smov 1024   ;;  %s201_s12 = int_to_ptr.hbm [resolvable:$true] %s200_s12 }
  0x31   : > { %s1243_s23 = smov 512   ;;  %s1244_s27 = smov 32  }
  0x32   : > { %911 = dma.hbm_to_vmem [thread:$0]  (!%p909_p13), %s201_s12, 4096, %s203_s4, %s189_s13, %s1242_s29, %s1243_s23, %s1244_s27  }
  0x33   : > { %214 = sbr.rel (%p1359_p11) target bundleno = 937 (0x3a9), region = 36  ;;  %s216_s15 = sand.u32 (!%p1359_p11), 1, %s1213_s19  }
  0x34   : > { %s875_s5 = sshll.u32 (!%p1359_p11), %s216_s15, 8  ;;  %s217_s6 = scalar_lea.sflag (!%p1359_p11), [#allocation5], %s216_s15 }
  0x35   : > { %s1408_s8 = scalar_lea.vmem (!%p1359_p11), [#allocation4], %s875_s5 }
  0x38   : > { %1184 = dma.done.wait (%p1340_p3), %s217_s6, 4096  }
  0x39   : > { %1186 = vsyncadd (%p1340_p3), %s217_s6, 4294963200 }
  0x3a   : > { %1188 = dma.done.wait (%p1331_p1), [#allocation8], 256  }
  0x3b   : > { %1190 = vsyncadd (%p1331_p1), [#allocation8], 4294967040  ;;  %s248_s2 = sand.u32 1, %s1201_s16   ;;  %p878_p11 = scmp.ne.s32.totalorder %s1221_s21, 0 }
  0x3c   : > { %s877_s4 = sshll.u32 %s248_s2, 4 }
  0x3d   : > { %s1421_s22 = scalar_lea.vmem [#allocation9], %s877_s4  ;;  %255 = sbr.rel (%p878_p11) target bundleno = 71 (0x47), region = 48 }
  0x42   : > { %vm256_vm0 = vcmask 523264   ;;  %vm259_vm1 = vcmask 7168   ;;  %v1245_v0 = vmov 0.0  }
  0x43   : > { %257 = vst.msk [vmem:[#allocation2] sm:$0xff] %vm256_vm0, %v1245_v0 }
  0x44   : > { %258 = vst.msk [vmem:[#allocation2 + $0x8] sm:$0xff] %vm256_vm0, %v1245_v0 }
  0x45   : > { %260 = vst.msk [vmem:[#allocation3] sm:$0xff] %vm259_vm1, %v1245_v0 }
  0x46   : > { %261 = vst.msk [vmem:[#allocation3 + $0x8] sm:$0xff] %vm259_vm1, %v1245_v0 }
  0x47 PF: > { %v1425_v1 = vld [vmem:[%s1408_s8 + $0xe0] sm:$0xff]  ;;  %v1428_v2 = vld [vmem:[%s1408_s8 + $0xe8] sm:$0xff]  ;;  %v1431_v3 = vld [vmem:[%s1408_s8 + $0xf0] sm:$0xff]  ;;  %vm308_vm2 = vcmask 523264   ;;  %s1696_s26 = sld [smem:[#allocation20_spill]]  ;;  %v1246_v35 = vmov 0  }
  0x48   : > { %323 = vmatpush.msra.mxu0 %v1425_v1  ;;  %346 = vmatpush.msra.mxu1 %v1428_v2  ;;  %v1436_v4 = vld [vmem:[%s1408_s8 + $0xf8] sm:$0xff]  ;;  %v1439_v5 = vld [vmem:[%s1408_s8 + $0xc0] sm:$0xff]  ;;  %v1442_v6 = vld [vmem:[%s1408_s8 + $0xc8] sm:$0xff]  ;;  %p887_p1 = scmp.ne.s32.totalorder %s1221_s21, 1 }
  0x49   : > { %369 = vmatpush.msra.mxu2 %v1431_v3  ;;  %392 = vmatpush.msra.mxu3 %v1436_v4  ;;  %v1447_v7 = vld [vmem:[%s1408_s8 + $0xd0] sm:$0xff]  ;;  %v1450_v8 = vld [vmem:[%s1408_s8 + $0xd8] sm:$0xff]  ;;  %v1453_v9 = vld [vmem:[%s1408_s8 + $0xa0] sm:$0xff] }
  0x4a   : > { %324 = vmatpush.msra.mxu0 %v1439_v5  ;;  %347 = vmatpush.msra.mxu1 %v1442_v6  ;;  %v1458_v10 = vld [vmem:[%s1408_s8 + $0xa8] sm:$0xff]  ;;  %v1461_v11 = vld [vmem:[%s1408_s8 + $0xb0] sm:$0xff]  ;;  %v1464_v12 = vld [vmem:[%s1408_s8 + $0xb8] sm:$0xff] }
  0x4b   : > { %370 = vmatpush.msra.mxu2 %v1447_v7  ;;  %393 = vmatpush.msra.mxu3 %v1450_v8  ;;  %v1469_v13 = vld [vmem:[%s1408_s8 + $0x80] sm:$0xff]  ;;  %v1472_v14 = vld [vmem:[%s1408_s8 + $0x88] sm:$0xff]  ;;  %v1477_v15 = vld [vmem:[%s1408_s8 + $0x90] sm:$0xff] }
  0x4c   : > { %325 = vmatpush.msra.mxu0 %v1453_v9  ;;  %348 = vmatpush.msra.mxu1 %v1458_v10  ;;  %v1480_v16 = vld [vmem:[%s1408_s8 + $0x98] sm:$0xff]  ;;  %v1485_v17 = vld [vmem:[%s1408_s8 + $0x60] sm:$0xff]  ;;  %v1488_v18 = vld [vmem:[%s1408_s8 + $0x68] sm:$0xff] }
  0x4d   : > { %371 = vmatpush.msra.mxu2 %v1461_v11  ;;  %394 = vmatpush.msra.mxu3 %v1464_v12  ;;  %v1493_v19 = vld [vmem:[%s1408_s8 + $0x70] sm:$0xff]  ;;  %v1496_v20 = vld [vmem:[%s1408_s8 + $0x78] sm:$0xff]  ;;  %v270_v21 = vld [vmem:[%s1408_s8 + $0x40] sm:$0xff] }
  0x4e   : > { %326 = vmatpush.msra.mxu0 %v1469_v13  ;;  %349 = vmatpush.msra.mxu1 %v1472_v14  ;;  %v1502_v22 = vld [vmem:[%s1408_s8 + $0x48] sm:$0xff]  ;;  %v1507_v23 = vld [vmem:[%s1408_s8 + $0x50] sm:$0xff]  ;;  %v1510_v24 = vld [vmem:[%s1408_s8 + $0x58] sm:$0xff] }
  0x4f   : > { %372 = vmatpush.msra.mxu2 %v1477_v15  ;;  %395 = vmatpush.msra.mxu3 %v1480_v16  ;;  %v266_v25 = vld [vmem:[%s1408_s8 + $0x20] sm:$0xff]  ;;  %v267_v26 = vld [vmem:[%s1408_s8 + $0x28] sm:$0xff]  ;;  %v268_v27 = vld [vmem:[%s1408_s8 + $0x30] sm:$0xff] }
  0x50   : > { %327 = vmatpush.msra.mxu0 %v1485_v17  ;;  %350 = vmatpush.msra.mxu1 %v1488_v18  ;;  %v269_v28 = vld [vmem:[%s1408_s8 + $0x38] sm:$0xff]  ;;  %v262_v29 = vld [vmem:[%s1408_s8] sm:$0xff]  ;;  %v263_v30 = vld [vmem:[%s1408_s8 + $0x8] sm:$0xff] }
  0x51   : > { %373 = vmatpush.msra.mxu2 %v1493_v19  ;;  %396 = vmatpush.msra.mxu3 %v1496_v20  ;;  %v264_v31 = vld [vmem:[%s1408_s8 + $0x10] sm:$0xff]  ;;  %v265_v32 = vld [vmem:[%s1408_s8 + $0x18] sm:$0xff]  ;;  %v294_v33 = vld [vmem:[%s1666_s1] sm:$0xff] }
  0x52   : > { %328 = vmatpush.msra.mxu0 %v270_v21  ;;  %351 = vmatpush.msra.mxu1 %v1502_v22  ;;  %v296_v34 = vld [vmem:[%s1696_s26] sm:$0xff]  ;;  %v295_v36 = vld [vmem:[%s1666_s1 + $0x8] sm:$0xff] }
  0x53   : > { %374 = vmatpush.msra.mxu2 %v1507_v23  ;;  %397 = vmatpush.msra.mxu3 %v1510_v24  ;;  %v297_v37 = vld [vmem:[%s1696_s26 + $0x8] sm:$0xff] }
  0x54   : > { %329 = vmatpush.msra.mxu0 %v266_v25  ;;  %352 = vmatpush.msra.mxu1 %v267_v26 }
  0x55   : > { %375 = vmatpush.msra.mxu2 %v268_v27  ;;  %398 = vmatpush.msra.mxu3 %v269_v28 }
  0x56   : > { %330 = vmatpush.msra.mxu0 %v262_v29  ;;  %353 = vmatpush.msra.mxu1 %v263_v30 }
  0x57   : > { %376 = vmatpush.msra.mxu2 %v264_v31  ;;  %399 = vmatpush.msra.mxu3 %v265_v32 }
  0x58   : > { %879 = vmatmul.msk.f32.vlgmr.msra.gmra.mxu0 %vm308_vm2, %v294_v33  ;;  %881 = vmatmul.msk.f32.vlgmr.msra.gmra.mxu1 %vm308_vm2, %v294_v33 }
  0x59   : > { %883 = vmatmul.msk.f32.vlgmr.msra.gmra.mxu2 %vm308_vm2, %v294_v33  ;;  %885 = vmatmul.msk.f32.vlgmr.msra.gmra.mxu3 %vm308_vm2, %v294_v33 }
  0x5a   : > { %1019 = vset.pattern.permute.xlu0 %v1246_v35  ;;  %561 = vmatpush.xpose.msrb.mxu0 %v1425_v1 }
  0x5b   : > { %300 = vperm.xlu0 %1019, %v296_v34   ;;  %584 = vmatpush.xpose.msrb.mxu1 %v1428_v2 }
  0x5c   : > { %607 = vmatpush.xpose.msrb.mxu2 %v1431_v3  ;;  %630 = vmatpush.xpose.msrb.mxu3 %v1436_v4 }
  0x5e   : > { %562 = vmatpush.xpose.msrb.mxu0 %v1439_v5 }
  0x5f   : > { %585 = vmatpush.xpose.msrb.mxu1 %v1442_v6 }
  0x60   : > { %880 = vmatmul.msk.f32.gmra.mxu0 %vm308_vm2, %v295_v36  ;;  %882 = vmatmul.msk.f32.gmra.mxu1 %vm308_vm2, %v295_v36 }
  0x61   : > { %884 = vmatmul.msk.f32.gmra.mxu2 %vm308_vm2, %v295_v36  ;;  %886 = vmatmul.msk.f32.gmra.mxu3 %vm308_vm2, %v295_v36 }
  0x62   : > { %563 = vmatpush.xpose.msrb.mxu0 %v1453_v9  ;;  %608 = vmatpush.xpose.msrb.mxu2 %v1447_v7 }
  0x63   : > { %305 = vperm.xlu0 %1019, %v297_v37   ;;  %586 = vmatpush.xpose.msrb.mxu1 %v1458_v10 }
  0x64   : > { %631 = vmatpush.xpose.msrb.mxu3 %v1450_v8 }
  0x66   : > { %564 = vmatpush.xpose.msrb.mxu0 %v1469_v13  ;;  %609 = vmatpush.xpose.msrb.mxu2 %v1461_v11 }
  0x67   : > { %587 = vmatpush.xpose.msrb.mxu1 %v1472_v14 }
  0x68   : > { %632 = vmatpush.xpose.msrb.mxu3 %v1464_v12 }
  0x6a   : > { %565 = vmatpush.xpose.msrb.mxu0 %v1485_v17  ;;  %610 = vmatpush.xpose.msrb.mxu2 %v1477_v15 }
  0x6b   : > { %588 = vmatpush.xpose.msrb.mxu1 %v1488_v18 }
  0x6c   : > { %633 = vmatpush.xpose.msrb.mxu3 %v1480_v16 }
  0x6e   : > { %566 = vmatpush.xpose.msrb.mxu0 %v270_v21  ;;  %611 = vmatpush.xpose.msrb.mxu2 %v1493_v19 }
  0x6f   : > { %589 = vmatpush.xpose.msrb.mxu1 %v1502_v22 }
  0x70   : > { %634 = vmatpush.xpose.msrb.mxu3 %v1496_v20 }
  0x72   : > { %567 = vmatpush.xpose.msrb.mxu0 %v266_v25  ;;  %612 = vmatpush.xpose.msrb.mxu2 %v1507_v23 }
  0x73   : > { %590 = vmatpush.xpose.msrb.mxu1 %v267_v26 }
  0x74   : > { %635 = vmatpush.xpose.msrb.mxu3 %v1510_v24 }
  0x76   : > { %568 = vmatpush.xpose.msrb.mxu0 %v262_v29  ;;  %613 = vmatpush.xpose.msrb.mxu2 %v268_v27 }
  0x77   : > { %591 = vmatpush.xpose.msrb.mxu1 %v263_v30 }
  0x78   : > { %636 = vmatpush.xpose.msrb.mxu3 %v269_v28 }
  0x7a   : > { %614 = vmatpush.xpose.msrb.mxu2 %v264_v31 }
  0x7c   : > { %637 = vmatpush.xpose.msrb.mxu3 %v265_v32 }
  0xcd   : > { %v301_v38 = vpop.permute.xlu0 %300 }
  0xd5   : > { %v332_v39 = vpop.f32.mrf.mxu0  ;;  %v355_v40 = vpop.f32.mrf.mxu1 }
  0xd6   : > { %v306_v41 = vpop.permute.xlu0 %305  ;;  %v333_v46 = vadd.f32 %v332_v39, %v301_v38  ;;  %v356_v47 = vadd.f32 %v355_v40, %v301_v38 }
  0xdc   : > { %v378_v42 = vpop.f32.mrf.mxu2  ;;  %v401_v43 = vpop.f32.mrf.mxu3 }
  0xdd   : > { %v335_v44 = vpop.f32.mrf.mxu0  ;;  %v358_v45 = vpop.f32.mrf.mxu1  ;;  %v379_v58 = vadd.f32 %v378_v42, %v301_v38  ;;  %v402_v59 = vadd.f32 %v401_v43, %v301_v38 }
  0xde   : > { %v336_v48 = vadd.f32 %v335_v44, %v306_v41  ;;  %v359_v49 = vadd.f32 %v358_v45, %v306_v41 }
  0xe0   : > { %v407_v50 = vmax.f32 %v333_v46, %v336_v48  ;;  %v414_v51 = vmax.f32 %v356_v47, %v359_v49 }
  0xe2   : > { %v408_v52 = vrot.slane %v407_v50, 4  ;;  %v415_v53 = vrot.slane %v414_v51, 4 }
  0xe4   : > { %v409_v54 = vmax.f32 %v407_v50, %v408_v52  ;;  %v416_v55 = vmax.f32 %v414_v51, %v415_v53  ;;  %v381_v56 = vpop.f32.mrf.mxu2  ;;  %v404_v57 = vpop.f32.mrf.mxu3 }
  0xe5   : > { %v382_v60 = vadd.f32 %v381_v56, %v306_v41  ;;  %v405_v61 = vadd.f32 %v404_v57, %v306_v41 }
  0xe6   : > { %v410_v62 = vrot.slane %v409_v54, 2  ;;  %v417_v63 = vrot.slane %v416_v55, 2 }
  0xe7   : > { %v421_v0 = vmax.f32 %v379_v58, %v382_v60  ;;  %v428_v1 = vmax.f32 %v402_v59, %v405_v61 }
  0xe8   : > { %v411_v2 = vmax.f32 %v409_v54, %v410_v62  ;;  %v418_v3 = vmax.f32 %v416_v55, %v417_v63 }
  0xe9   : > { %v422_v4 = vrot.slane %v421_v0, 4  ;;  %v429_v5 = vrot.slane %v428_v1, 4 }
  0xea   : > { %v412_v6 = vrot.slane %v411_v2, 1  ;;  %v419_v7 = vrot.slane %v418_v3, 1 }
  0xeb   : > { %v423_v8 = vmax.f32 %v421_v0, %v422_v4  ;;  %v430_v9 = vmax.f32 %v428_v1, %v429_v5 }
  0xec   : > { %v413_v10 = vmax.f32 %v411_v2, %v412_v6  ;;  %v420_v11 = vmax.f32 %v418_v3, %v419_v7 }
  0xed   : > { %v424_v12 = vrot.slane %v423_v8, 2  ;;  %v431_v13 = vrot.slane %v430_v9, 2 }
  0xee   : > { %v435_v14 = vsub.f32 %v333_v46, %v413_v10  ;;  %v439_v15 = vsub.f32 %v336_v48, %v413_v10  ;;  %v436_v16 = vsub.f32 %v356_v47, %v420_v11  ;;  %v440_v17 = vsub.f32 %v359_v49, %v420_v11 }
  0xef   : > { %v425_v18 = vmax.f32 %v423_v8, %v424_v12  ;;  %v432_v19 = vmax.f32 %v430_v9, %v431_v13 }
  0xf0   : > { %v443_v20 = vmul.f32 1.442695, %v435_v14  ;;  %v451_v21 = vmul.f32 1.442695, %v439_v15  ;;  %v445_v22 = vmul.f32 1.442695, %v436_v16 }
  0xf1   : > { %v453_v23 = vmul.f32 1.442695, %v440_v17  ;;  %v426_v24 = vrot.slane %v425_v18, 1  ;;  %v433_v25 = vrot.slane %v432_v19, 1 }
  0xf2   : > { %1020 = vpow2.f32 %v443_v20 }
  0xf3   : > { %1022 = vpow2.f32 %v451_v21  ;;  %v427_v26 = vmax.f32 %v425_v18, %v426_v24  ;;  %v434_v27 = vmax.f32 %v432_v19, %v433_v25 }
  0xf4   : > { %1024 = vpow2.f32 %v445_v22 }
  0xf5   : > { %1026 = vpow2.f32 %v453_v23  ;;  %v437_v28 = vsub.f32 %v379_v58, %v427_v26  ;;  %v441_v29 = vsub.f32 %v382_v60, %v427_v26  ;;  %v438_v30 = vsub.f32 %v402_v59, %v434_v27 }
  0xf6   : > { %v442_v31 = vsub.f32 %v405_v61, %v434_v27 }
  0xf7   : > { %v447_v32 = vmul.f32 1.442695, %v437_v28  ;;  %v455_v33 = vmul.f32 1.442695, %v441_v29  ;;  %v449_v34 = vmul.f32 1.442695, %v438_v30 }
  0xf8   : > { %v1568_v35 = vpop.eup %1020  ;;  %v457_v36 = vmul.f32 1.442695, %v442_v31 }
  0xf9   : > { %v1570_v37 = vpop.eup %1022  ;;  %1028 = vpow2.f32 %v447_v32 }
  0xfa   : > { %v1572_v38 = vpop.eup %1024  ;;  %v459_v39 = vadd.f32 %v1570_v37, %v1568_v35  ;;  %1030 = vpow2.f32 %v455_v33 }
  0xfb   : > { %v1576_v40 = vpop.eup %1026  ;;  %1032 = vpow2.f32 %v449_v34 }
  0xfc   : > { %v460_v41 = vrot.slane %v459_v39, 4  ;;  %v466_v42 = vadd.f32 %v1576_v40, %v1572_v38  ;;  %1034 = vpow2.f32 %v457_v36 }
  0xfe   : > { %v461_v43 = vadd.f32 %v460_v41, %v459_v39  ;;  %v467_v44 = vrot.slane %v466_v42, 4 }
  0xff   : > { %v1580_v45 = vpop.eup %1028 }
 0x100   : > { %v1582_v46 = vpop.eup %1030  ;;  %v462_v47 = vrot.slane %v461_v43, 2  ;;  %v468_v48 = vadd.f32 %v467_v44, %v466_v42 }
 0x101   : > { %v1584_v49 = vpop.eup %1032  ;;  %v473_v50 = vadd.f32 %v1582_v46, %v1580_v45 }
 0x102   : > { %v1588_v51 = vpop.eup %1034  ;;  %v463_v52 = vadd.f32 %v462_v47, %v461_v43  ;;  %v469_v53 = vrot.slane %v468_v48, 2 }
 0x103   : > { %v474_v54 = vrot.slane %v473_v50, 4  ;;  %v480_v55 = vadd.f32 %v1588_v51, %v1584_v49 }
 0x104   : > { %v464_v56 = vrot.slane %v463_v52, 1  ;;  %v470_v57 = vadd.f32 %v469_v53, %v468_v48 }
 0x105   : > { %v475_v58 = vadd.f32 %v474_v54, %v473_v50  ;;  %v481_v59 = vrot.slane %v480_v55, 4 }
 0x106   : > { %v465_v60 = vadd.f32 %v464_v56, %v463_v52  ;;  %v471_v61 = vrot.slane %v470_v57, 1 }
 0x107   : > { %v476_v62 = vrot.slane %v475_v58, 2  ;;  %v482_v63 = vadd.f32 %v481_v59, %v480_v55 }
 0x108   : > { %1036 = vrcp.f32 %v465_v60  ;;  %v472_v0 = vadd.f32 %v471_v61, %v470_v57  ;;  %v496_v13 = vand.u32 2147483647, %v465_v60  ;;  %v498_v14 = vand.u32 2147483648, %v465_v60 }
 0x109   : > { %v477_v1 = vadd.f32 %v476_v62, %v475_v58  ;;  %v483_v2 = vrot.slane %v482_v63, 2  ;;  %vm492_vm4 = vweird.f32 %v465_v60 }
 0x10a   : > { %1038 = vrcp.f32 %v472_v0  ;;  %v510_v17 = vand.u32 2147483647, %v472_v0  ;;  %v512_v18 = vand.u32 2147483648, %v472_v0  ;;  %vm497_vm7 = vcmp.eq.f32.partialorder %v496_v13, 8.507059e+37 }
 0x10b   : > { %v478_v3 = vrot.slane %v477_v1, 1  ;;  %v484_v4 = vadd.f32 %v483_v2, %v482_v63  ;;  %v499_v22 = vor.u32 1.1754944e-38, %v498_v14  ;;  %vm506_vm8 = vweird.f32 %v472_v0  ;;  %v649_v2 = vld [vmem:[#allocation3] sm:$0xff] }
 0x10c   : > { %vm511_vm9 = vcmp.eq.f32.partialorder %v510_v17, 8.507059e+37  ;;  %v513_v28 = vor.u32 1.1754944e-38, %v512_v18  ;;  %v552_v18 = vld [vmem:[#allocation2 + $0x8] sm:$0xff] }
 0x10d   : > { %v479_v5 = vadd.f32 %v478_v3, %v477_v1  ;;  %v485_v6 = vrot.slane %v484_v4, 1 }
 0x10e   : > { %v1037_v7 = vpop.eup %1036 }
 0x10f   : > { %1040 = vrcp.f32 %v479_v5  ;;  %v486_v8 = vadd.f32 %v485_v6, %v484_v4  ;;  %v488_v9 = vmul.f32 %v1037_v7, %v465_v60  ;;  %vm493_vm3 = vweird.f32 %v1037_v7 }
 0x110   : > { %v1039_v10 = vpop.eup %1038  ;;  %vm494_vm6 = vmor %vm492_vm4, %vm493_vm3  ;;  %v524_v33 = vand.u32 2147483647, %v479_v5  ;;  %v526_v34 = vand.u32 2147483648, %v479_v5  ;;  %vm520_vm12 = vweird.f32 %v479_v5  ;;  %vm663_vm4 = vcmask 7168  }
 0x111   : > { %1042 = vrcp.f32 %v486_v8  ;;  %v489_v11 = vsub.f32 1.0, %v488_v9  ;;  %v502_v12 = vmul.f32 %v1039_v10, %v472_v0  ;;  %vm507_vm5 = vweird.f32 %v1039_v10 }
 0x112   : > { %vm508_vm10 = vmor %vm506_vm8, %vm507_vm5  ;;  %v540_v43 = vand.u32 2147483648, %v486_v8  ;;  %v538_v48 = vand.u32 2147483647, %v486_v8  ;;  %v527_v50 = vor.u32 1.1754944e-38, %v526_v34  ;;  %vm525_vm15 = vcmp.eq.f32.partialorder %v524_v33, 8.507059e+37 }
 0x113   : > { %v490_v15 = vmul.f32 %v1037_v7, %v489_v11  ;;  %v503_v16 = vsub.f32 1.0, %v502_v12  ;;  %vm534_vm0 = vweird.f32 %v486_v8 }
 0x114   : > { %v541_v54 = vor.u32 1.1754944e-38, %v540_v43  ;;  %vm539_vm3 = vcmp.eq.f32.partialorder %v538_v48, 8.507059e+37 }
 0x115   : > { %v1041_v19 = vpop.eup %1040  ;;  %v491_v20 = vadd.f32 %v1037_v7, %v490_v15  ;;  %v504_v21 = vmul.f32 %v1039_v10, %v503_v16 }
 0x116   : > { %v516_v23 = vmul.f32 %v1041_v19, %v479_v5  ;;  %vm521_vm11 = vweird.f32 %v1041_v19  ;;  %v650_v5 = vld [vmem:[#allocation3 + $0x8] sm:$0xff] }
 0x117   : > { %v1043_v24 = vpop.eup %1042  ;;  %v495_v25 = vsel %vm494_vm6, %v1037_v7, %v491_v20  ;;  %v505_v26 = vadd.f32 %v1039_v10, %v504_v21  ;;  %vm522_vm14 = vmor %vm520_vm12, %vm521_vm11 }
 0x118   : > { %v500_v27 = vsel %vm497_vm7, %v499_v22, %v495_v25  ;;  %v517_v29 = vsub.f32 1.0, %v516_v23  ;;  %v530_v30 = vmul.f32 %v1043_v24, %v486_v8  ;;  %vm535_vm13 = vweird.f32 %v1043_v24 }
 0x119   : > { %v543_v31 = vmul.f32 %v1568_v35, %v500_v27  ;;  %v509_v32 = vsel %vm508_vm10, %v1039_v10, %v505_v26  ;;  %vm536_vm1 = vmor %vm534_vm0, %vm535_vm13  ;;  %v547_v58 = vmul.f32 %v1570_v37, %v500_v27  ;;  %v551_v10 = vld [vmem:[#allocation2] sm:$0xff] }
 0x11a   : > { %v514_v36 = vsel %vm511_vm9, %v513_v28, %v509_v32  ;;  %v518_v39 = vmul.f32 %v1041_v19, %v517_v29  ;;  %v531_v41 = vsub.f32 1.0, %v530_v30 }
 0x11b   : > { %569 = vmatmul.f32.vlgmr.msrb.gmra.mxu0 %v543_v31  ;;  %v544_v42 = vmul.f32 %v1572_v38, %v514_v36  ;;  %v548_v60 = vmul.f32 %v1576_v40, %v514_v36 }
 0x11c   : > { %v519_v44 = vadd.f32 %v1041_v19, %v518_v39  ;;  %v532_v47 = vmul.f32 %v1043_v24, %v531_v41 }
 0x11d   : > { %592 = vmatmul.f32.vlgmr.msrb.gmra.mxu1 %v544_v42  ;;  %v651_v38 = vadd.f32 %v544_v42, %v543_v31  ;;  %v656_v0 = vadd.f32 %v548_v60, %v547_v58 }
 0x11e   : > { %v523_v35 = vsel %vm522_vm14, %v1041_v19, %v519_v44  ;;  %v533_v52 = vadd.f32 %v1043_v24, %v532_v47 }
 0x11f   : > { %v528_v53 = vsel %vm525_vm15, %v527_v50, %v523_v35 }
 0x120   : > { %v545_v55 = vmul.f32 %v1580_v45, %v528_v53  ;;  %v537_v56 = vsel %vm536_vm1, %v1043_v24, %v533_v52  ;;  %v549_v63 = vmul.f32 %v1582_v46, %v528_v53 }
 0x121   : > { %v542_v57 = vsel %vm539_vm3, %v541_v54, %v537_v56 }
 0x122   : > { %615 = vmatmul.f32.vlgmr.msrb.gmra.mxu2 %v545_v55  ;;  %v546_v59 = vmul.f32 %v1584_v49, %v542_v57  ;;  %v652_v61 = vadd.f32 %v651_v38, %v545_v55  ;;  %v657_v45 = vadd.f32 %v656_v0, %v549_v63  ;;  %v550_v1 = vmul.f32 %v1588_v51, %v542_v57 }
 0x123   : > { %572 = vmatmul.f32.gmra.mxu0 %v547_v58 }
 0x124   : > { %638 = vmatmul.f32.vlgmr.msrb.gmra.mxu3 %v546_v59  ;;  %v653_v62 = vadd.f32 %v652_v61, %v546_v59  ;;  %v658_v37 = vadd.f32 %v657_v45, %v550_v1 }
 0x125   : > { %595 = vmatmul.f32.gmra.mxu1 %v548_v60 }
 0x126   : > { %654 = vadd.xlane.f32.xlu1 %v653_v62 }
 0x12a   : > { %618 = vmatmul.f32.gmra.mxu2 %v549_v63 }
 0x12c   : > { %641 = vmatmul.f32.gmra.mxu3 %v550_v1 }
 0x12e   : > { %659 = vadd.xlane.f32.xlu1 %v658_v37 }
 0x198   : > { %v570_v4 = vpop.f32.mrf.mxu0 }
 0x199   : > { %v655_v49 = vpop.xlane.xlu1 %654 }
 0x19a   : > { %v661_v40 = vadd.f32 %v655_v49, %v649_v2  ;;  %v593_v3 = vpop.f32.mrf.mxu1 }
 0x19b   : > { %v594_v7 = vadd.f32 %v593_v3, %v570_v4 }
 0x19c   : > { %664 = vst.msk [vmem:[#allocation3] sm:$0xff] %vm663_vm4, %v661_v40 }
 0x1a0   : > { %v573_v13 = vpop.f32.mrf.mxu0 }
 0x1a1   : > { %v660_v6 = vpop.xlane.xlu1 %659 }
 0x1a2   : > { %v662_v46 = vadd.f32 %v660_v6, %v650_v5  ;;  %v596_v12 = vpop.f32.mrf.mxu1 }
 0x1a3   : > { %v597_v15 = vadd.f32 %v596_v12, %v573_v13 }
 0x1a4   : > { %665 = vst.msk [vmem:[#allocation3 + $0x8] sm:$0xff] %vm663_vm4, %v662_v46 }
 0x1a5   : > { %v616_v8 = vpop.f32.mrf.mxu2 }
 0x1a6   : > { %v617_v9 = vadd.f32 %v616_v8, %v594_v7 }
 0x1a7   : > { %v639_v11 = vpop.f32.mrf.mxu3 }
 0x1a8   : > { %v640_v51 = vadd.f32 %v639_v11, %v617_v9 }
 0x1aa   : > { %v645_v14 = vadd.f32 %v640_v51, %v551_v10 }
 0x1ac   : > { %647 = vst.msk [vmem:[#allocation2] sm:$0xff] %vm308_vm2, %v645_v14 }
 0x1ad   : > { %v619_v16 = vpop.f32.mrf.mxu2 }
 0x1ae   : > { %v620_v17 = vadd.f32 %v619_v16, %v597_v15 }
 0x1af   : > { %v642_v19 = vpop.f32.mrf.mxu3 }
 0x1b0   : > { %v643_v20 = vadd.f32 %v642_v19, %v620_v17  ;;  %669 = sbr.rel (%p887_p1) target bundleno = 915 (0x393), region = 52 }
 0x1b2   : > { %v646_v21 = vadd.f32 %v643_v20, %v552_v18 }
 0x1b4   : > { %648 = vst.msk [vmem:[#allocation2 + $0x8] sm:$0xff] %vm308_vm2, %v646_v21 }
 0x1b5   : > { %v672_v22 = vld [vmem:[#allocation3] sm:$0xff]  ;;  %v1247_v23 = vmov 0   ;;  %v673_v24 = vld [vmem:[#allocation3 + $0x8] sm:$0xff]  ;;  %v674_v25 = vld [vmem:[#allocation7] sm:$0xff] }
 0x1b6   : > { %1044 = vset.pattern.permute.xlu0 %v1247_v23  ;;  %v670_v27 = vld [vmem:[#allocation2] sm:$0xff]  ;;  %v675_v31 = vld [vmem:[#allocation7 + $0x8] sm:$0xff] }
 0x1b7   : > { %678 = vperm.xlu0 %1044, %v672_v22  }
 0x1bb   : > { %v671_v34 = vld [vmem:[#allocation2 + $0x8] sm:$0xff] }
 0x1bf   : > { %683 = vperm.xlu0 %1044, %v673_v24  }
 0x229   : > { %v679_v26 = vpop.permute.xlu0 %678 }
 0x22a   : > { %v686_v28 = vmul.f32 %v679_v26, %v674_v25 }
 0x22c   : > { %v688_v29 = vsub.f32 %v670_v27, %v686_v28 }
 0x22e   : > { %v690_v30 = vmul.f32 %v688_v29, %v688_v29 }
 0x230   : > { %v692_v32 = vsel %vm308_vm2, %v690_v30, 0.0 }
 0x231   : > { %v684_v33 = vpop.permute.xlu0 %683  ;;  %693 = vadd.xlane.f32.xlu1 %v692_v32 }
 0x232   : > { %v687_v36 = vmul.f32 %v684_v33, %v675_v31 }
 0x234   : > { %v689_v39 = vsub.f32 %v671_v34, %v687_v36 }
 0x236   : > { %v691_v41 = vmul.f32 %v689_v39, %v689_v39 }
 0x238   : > { %v695_v42 = vsel %vm308_vm2, %v691_v41, 0.0 }
 0x239   : > { %696 = vadd.xlane.f32.xlu1 %v695_v42 }
 0x2a4   : > { %v694_v43 = vpop.xlane.xlu1 %693 }
 0x2a5   : > { %v698_v44 = vmax.f32 %v694_v43, 1e-24 }
 0x2a7   : > { %1045 = vrsqrt.f32 %v698_v44  ;;  %vm706_vm6 = vweird.f32 %v698_v44 }
 0x2ac   : > { %v697_v47 = vpop.xlane.xlu1 %696 }
 0x2ad   : > { %v1046_v48 = vpop.eup %1045  ;;  %v699_v50 = vmax.f32 %v697_v47, 1e-24 }
 0x2ae   : > { %v701_v35 = vmul.f32 %v1046_v48, %v698_v44  ;;  %vm707_vm5 = vweird.f32 %v1046_v48 }
 0x2af   : > { %1047 = vrsqrt.f32 %v699_v50  ;;  %vm708_vm7 = vmor %vm706_vm6, %vm707_vm5  ;;  %vm716_vm9 = vweird.f32 %v699_v50 }
 0x2b0   : > { %v702_v52 = vmul.f32 %v1046_v48, %v701_v35 }
 0x2b2   : > { %v703_v53 = vmul.f32 0.5, %v702_v52 }
 0x2b4   : > { %v704_v54 = vsub.f32 1.5, %v703_v53 }
 0x2b5   : > { %v1048_v55 = vpop.eup %1047 }
 0x2b6   : > { %v711_v56 = vmul.f32 %v1048_v55, %v699_v50  ;;  %v705_v38 = vmul.f32 %v1046_v48, %v704_v54  ;;  %vm717_vm8 = vweird.f32 %v1048_v55 }
 0x2b7   : > { %vm718_vm10 = vmor %vm716_vm9, %vm717_vm8 }
 0x2b8   : > { %v712_v57 = vmul.f32 %v1048_v55, %v711_v56  ;;  %v709_v59 = vsel %vm708_vm7, %v1046_v48, %v705_v38 }
 0x2b9   : > { %v720_v61 = vmul.f32 %v709_v59, %v688_v29 }
 0x2ba   : > { %v713_v58 = vmul.f32 0.5, %v712_v57 }
 0x2bb   : > { %v722_v45 = vmul.f32 %v720_v61, %v720_v61 }
 0x2bc   : > { %v714_v60 = vsub.f32 1.5, %v713_v58 }
 0x2bd   : > { %v724_v37 = vsel %vm308_vm2, %v722_v45, 0.0 }
 0x2be   : > { %v715_v62 = vmul.f32 %v1048_v55, %v714_v60 }
 0x2c0   : > { %v719_v63 = vsel %vm718_vm10, %v1048_v55, %v715_v62 }
 0x2c1   : > { %v721_v0 = vmul.f32 %v719_v63, %v689_v39 }
 0x2c3   : > { %v723_v1 = vmul.f32 %v721_v0, %v721_v0 }
 0x2c5   : > { %v725_v2 = vsel %vm308_vm2, %v723_v1, 0.0 }
 0x2c6   : > { %v726_v49 = vadd.f32 %v725_v2, %v724_v37 }
 0x2c8   : > { %727 = vadd.xlane.f32.xlu2 %v726_v49 }
 0x33b   : > { %v728_v40 = vpop.xlane.xlu2 %727 }
 0x33c   : > { %v729_v3 = vrot.slane %v728_v40, 4 }
 0x33e   : > { %v730_v4 = vadd.f32 %v729_v3, %v728_v40 }
 0x340   : > { %v731_v5 = vrot.slane %v730_v4, 2 }
 0x342   : > { %v732_v6 = vadd.f32 %v731_v5, %v730_v4 }
 0x344   : > { %v733_v46 = vrot.slane %v732_v6, 1 }
 0x346   : > { %v734_v7 = vadd.f32 %v733_v46, %v732_v6 }
 0x348   : > { %894 = vpush %v734_v7 }
 0x379   : > { %s895_s21 = spop %894 }
 0x37a   : > { %v736_v8 = vstv %s895_s21 }
 0x37b   : > { %v737_v9 = vmax.f32 %v736_v8, 1e-24 }
 0x37d   : > { %1049 = vrsqrt.f32 %v737_v9  ;;  %vm744_vm12 = vweird.f32 %v737_v9 }
 0x383   : > { %v1050_v10 = vpop.eup %1049 }
 0x384   : > { %v739_v11 = vmul.f32 %v1050_v10, %v737_v9  ;;  %vm745_vm11 = vweird.f32 %v1050_v10 }
 0x385   : > { %vm746_vm13 = vmor %vm744_vm12, %vm745_vm11 }
 0x386   : > { %v740_v51 = vmul.f32 %v1050_v10, %v739_v11 }
 0x388   : > { %v741_v12 = vmul.f32 0.5, %v740_v51 }
 0x38a   : > { %v742_v13 = vsub.f32 1.5, %v741_v12 }
 0x38c   : > { %v743_v14 = vmul.f32 %v1050_v10, %v742_v13 }
 0x38e   : > { %v747_v15 = vsel %vm746_vm13, %v1050_v10, %v743_v14 }
 0x38f   : > { %v748_v16 = vmul.f32 %v747_v15, %v720_v61  ;;  %v749_v17 = vmul.f32 %v747_v15, %v721_v0 }
 0x391   : > { %750 = vst.msk [vmem:[%s1421_s22] sm:$0xff] %vm308_vm2, %v748_v16 }
 0x392   : > { %751 = vst.msk [vmem:[%s1421_s22 + $0x8] sm:$0xff] %vm308_vm2, %v749_v17 }
 0x393 PF: > { %s1697_s12 = sld [smem:[#allocation14_spill]]  ;;  %s765_s8 = sshll.u32 %s1421_s22, 4  ;;  %s766_s8 = int_to_ptr.vmem [resolvable:$true] %s765_s8 }
 0x394   : > { %s1699_s5 = sld [smem:[#allocation22_spill]]  ;;  %s753_s23 = scalar_lea.sflag [#allocation6], %s248_s2 }
 0x399   : > { %s893_s29 = sshll.u32 %s1697_s12, 4 }
 0x39a   : > { %s764_s6 = scalar_lea.hbm %s1699_s5, %s893_s29  ;;  %s1131_s11 = scalar_lea.hbm %s1699_s5, 32 }
 0x39b   : > { %s767_s4 = sshll.u32 %s764_s6, 4  ;;  %s768_s4 = int_to_ptr.hbm [resolvable:$true] %s767_s4 }
 0x39c   : > { %s1125_s28 = sshra.s32 %s768_s4, 4  ;;  %s1126_s28 = int_to_ptr.hbm [resolvable:$true] %s1125_s28 }
 0x39d   : > { %s1127_s30 = scalar_lea.hbm %s1126_s28, 16  ;;  %p1132_p4 = scmp.lt.s32.totalorder %s1126_s28, %s1699_s5 }
 0x39e   : > { %p1128_p3 = scmp.ne.s32.totalorder %s1126_s28, %s1127_s30  ;;  %p1133_p5 = scmp.lt.s32.totalorder %s1131_s11, %s1127_s30 }
 0x3a0   : > { %p1129_p0 = pnand %p1128_p3, %p1346_p7  ;;  %p1134_p6 = por %p1133_p5, %p1132_p4 }
 0x3a2   : > { %p1130_p2 = pneg %p1129_p0 }
 0x3a4   : > { %p1135_p8 = pnand %p1134_p6, %p1130_p2 }
 0x3a6   : > { %1138 = shalt.err (!%p1135_p8)
}
 0x3a7   : > { %s1248_s2 = smov 128   ;;  %s1249_s22 = smov 8  }
 0x3a8   : > { %902 = dma.vmem_to_hbm [thread:$0]  (%p1346_p7), %s766_s8, 256, %s768_s4, %s753_s23, %s1248_s2, %s1248_s2, %s1249_s22  }
 0x3a9 PF: > { %s1700_s21 = sld [smem:[#allocation13_spill]]  ;;  %p919_p10 = scmp.ge.s32.totalorder %s1237_s25, 2 }
 0x3ab   : > { %p913_p12 = pnand %p919_p10, %p1351_p9 }
 0x3ad   : > { %p914_p13 = pneg %p913_p12 }
 0x3af   : > { %s782_s29 = sand.u32 1, %s1700_s21  }
 0x3b0   : > { %s783_s27 = scalar_lea.sflag [#allocation6], %s782_s29 }
 0x3b1   : > { %1192 = dma.done.wait (%p914_p13), %s783_s27, 256  }
 0x3b2   : > { %1194 = vsyncadd (%p914_p13), %s783_s27, 4294967040  ;;  %s21_s25 = sadd.s32 1, %s1237_s25   ;;  %s1702_s13 = smov %s1395_s18 }
 0x3b3   : > { %p18_p11 = scmp.ge.s32.totalorder %s21_s25, 6   ;;  %s1703_s21 = sld [smem:[#allocation15_spill]] }
 0x3b4   : > { %s1704_s23 = sld [smem:[#allocation18_spill]]  ;;  %s1706_s15 = smov %s1201_s16 }
 0x3b5   : > { %s1705_s6 = sld [smem:[#allocation19_spill]]  ;;  %s1707_s16 = smov %s1205_s17 }
 0x3b6   : > { %s1708_s17 = smov %s1392_s3  ;;  %s1709_s18 = smov %s1213_s19 }
 0x3b7   : > { %s1710_s19 = smov %s1217_s20  ;;  %s1711_s20 = smov %s1702_s13 }
 0x3b8   : > { %s1712_s22 = smov %s1233_s24  ;;  %20 = sbr.rel (!%p18_p11) target bundleno = 14 (0xe), region = 93 }
 0x3bb   : > { %s1713_s24 = smov %s1705_s6 }
 0x3bd   :  { %789 = vsyncpa [#allocation5], 1 }
 0x3be   :  { %791 = vsyncpa [#allocation5 + $0x1], 1 }
 0x3bf   :  { %792 = vsyncpa [#allocation8], 1 }
 0x3c0   :  { %793 = vsyncpa [#allocation6], 1 }
 0x3c1   :  { %795 = vsyncpa [#allocation6 + $0x1], 1 }

</bundles_post_ra>
